<compile_context>
chip_gen: v7x
topology: tpu7x:2x2x1
jax: 0.10.0
libtpu: 0.0.40
codegen_flags: <defaults>
</compile_context>

<pallas_src>
import functools

import jax
import jax.numpy as jnp
from jax.experimental import pallas as pl
from jax.experimental.pallas import tpu as pltpu


def _round_up(a, b):
    return (a + b - 1) // b * b


def _default_tiling():
    """Per-generation defaults: (kv_block, vmem_limit_bytes)."""
    vmem_bytes = 128 * 1024 * 1024
    try:
        info = pltpu.get_tpu_info()
        vmem_bytes = int(getattr(info, "vmem_capacity_bytes", vmem_bytes))
    except Exception:
        pass
    if vmem_bytes <= 64 * 1024 * 1024:        # v7x-class: tighter VMEM
        return 256, 40 * 1024 * 1024
    return 1024, 64 * 1024 * 1024             # v5e / v6e: 128 MiB VMEM


def channel_attention_kernel(x_ref, w_ref, b_ref, o_ref, qkv_ref, m_ref, l_ref, *,
                             C, CrA, CvA, pen_row, Tk, n_true, n_pad,
                             compute_dtype, exp_dtype):
    kv = pl.program_id(1)
    n_kv = pl.num_programs(1)
    f32 = jnp.float32

    # --- per-batch init: fused projection (+bias), stat/accumulator reset ----
    @pl.when(kv == 0)
    def _init():
        x = x_ref[0]                                        # (C, N_pad) f32
        w = w_ref[...]                                      # (R, C) compute_dtype
        qkv = jnp.dot(w, x.astype(compute_dtype),
                      preferred_element_type=f32)           # (R, N_pad) f32
        qkv = qkv + b_ref[...]                              # bias broadcast (R,1)
        if n_pad != n_true:
            # Poison padded key columns ONCE: row `pen_row` of the k-section is
            # contracted against the all-ones spare query row inside the score
            # matmul, so no per-step jnp.where mask is needed.
            row = jax.lax.broadcasted_iota(jnp.int32, (qkv.shape[0], 1), 0)
            col = jax.lax.broadcasted_iota(jnp.int32, (1, n_pad), 1)
            qkv = jnp.where((row == pen_row) & (col >= n_true),
                            jnp.float32(-1e30), qkv)
        qkv_ref[...] = qkv.astype(compute_dtype)
        m_ref[...] = jnp.full((1, n_pad), -jnp.inf, dtype=f32)
        l_ref[...] = jnp.zeros((1, n_pad), dtype=f32)
        o_ref[0] = jnp.zeros((C, n_pad), dtype=f32)

    # --- slice q (all queries) and this step's key/value tile ----------------
    start = pl.multiple_of(kv * Tk, 128)
    q = qkv_ref[0:CrA, :]                                   # (CrA, N_pad)
    k_t = qkv_ref[CrA:2 * CrA, pl.ds(start, Tk)]            # (CrA, Tk)
    v_t = qkv_ref[2 * CrA:2 * CrA + CvA, pl.ds(start, Tk)]  # (CvA, Tk)

    # scores, key-major: s[n, m] = sum_r k[r, n] * q[r, m]  -> (Tk, N_pad)
    # (key-padding penalty already folded in via the spare q/k rows)
    s = jax.lax.dot_general(k_t, q, (((0,), (0,)), ((), ())),
                            preferred_element_type=f32)

    # --- online softmax over the key axis (axis 0) ---------------------------
    m_prev = m_ref[...]                                     # (1, N_pad) f32
    l_prev = l_ref[...]                                     # (1, N_pad) f32
    m_cur = jnp.max(s, axis=0, keepdims=True)
    m_new = jnp.maximum(m_prev, m_cur)
    alpha = jnp.exp(m_prev - m_new)                         # (1, N_pad) f32
    p = jnp.exp((s - m_new).astype(exp_dtype))              # (Tk, N_pad)

    # (CvA, Tk) @ (Tk, N_pad): rows [:C] = unnormalized output, row C = sum(p)
    pv = jnp.dot(v_t, p.astype(compute_dtype), preferred_element_type=f32)
    l_ref[...] = alpha * l_prev + pv[C:C + 1, :]
    m_ref[...] = m_new
    o_ref[0] = alpha * o_ref[0] + pv[:C, :]

    # --- finalize: normalize + residual --------------------------------------
    @pl.when(kv == n_kv - 1)
    def _finalize():
        approx = jnp.dtype(compute_dtype) != jnp.dtype(jnp.float32)
        inv_l = pl.reciprocal(l_ref[...], approx=approx)    # (1, N_pad)
        o_ref[0] = o_ref[0] * inv_l + x_ref[0]


def channel_attention(x_nchw, wq, bq, wk, bk, wv, bv, gamma, *,
                      compute_dtype=jnp.bfloat16, exp_dtype=None,
                      kv_block=None, vmem_limit_bytes=None):
    B, C, W, H = x_nchw.shape
    N = W * H
    Cr = wq.shape[0]
    f32 = jnp.float32
    compute_dtype = jnp.dtype(compute_dtype)
    # On v5e (no bf16 EUP/VPU) pass exp_dtype=jnp.float32 explicitly.
    exp_dtype = compute_dtype if exp_dtype is None else jnp.dtype(exp_dtype)

    auto_kv, auto_vmem = _default_tiling()
    kv_block = auto_kv if kv_block is None else int(kv_block)
    vmem_limit_bytes = auto_vmem if vmem_limit_bytes is None else int(vmem_limit_bytes)

    # Sublane packing of the compute dtype: qkv-scratch section offsets/sizes
    # must be multiples of this so every slice is a free, tile-aligned view.
    sub = max(8, 32 // compute_dtype.itemsize)          # 8 for f32, 16 for bf16
    CrA = _round_up(Cr + 1, sub)   # +1 spare row: all-ones q row / penalty k row
    CvA = _round_up(C + 1, sub)    # +1 ones row: sum(p) folded into the MXU
    R = 2 * CrA + CvA
    pen_row = CrA + Cr             # key-padding penalty row (within k-section)

    # Fused projection weights / biases; gamma folded into the value rows.
    g = gamma.reshape(()).astype(f32)
    w_full = jnp.zeros((R, C), f32)
    b_full = jnp.zeros((R, 1), f32)
    w_full = w_full.at[0:Cr].set(wq.astype(f32))
    b_full = b_full.at[0:Cr].set(bq.astype(f32).reshape(Cr, 1))
    b_full = b_full.at[Cr, 0].set(1.0)                         # spare q row == 1
    w_full = w_full.at[CrA:CrA + Cr].set(wk.astype(f32))
    b_full = b_full.at[CrA:CrA + Cr].set(bk.astype(f32).reshape(Cr, 1))
    w_full = w_full.at[2 * CrA:2 * CrA + C].set(wv.astype(f32) * g)
    b_full = b_full.at[2 * CrA:2 * CrA + C].set(bv.astype(f32).reshape(C, 1) * g)
    b_full = b_full.at[2 * CrA + C, 0].set(1.0)                # MXU row-sum row
    w_cd = w_full.astype(compute_dtype)

    # Lane-dense spatial padding; kv tile forced to a multiple of 128.
    N128 = _round_up(N, 128)
    Tk = _round_up(min(kv_block, N128), 128)
    N_pad = _round_up(N128, Tk)
    KV = N_pad // Tk

    x_flat = x_nchw.reshape(B, C, N).astype(f32)
    if N_pad != N:
        x_flat = jnp.pad(x_flat, ((0, 0), (0, 0), (0, N_pad - N)))

    kernel = functools.partial(
        channel_attention_kernel,
        C=C, CrA=CrA, CvA=CvA, pen_row=pen_row, Tk=Tk,
        n_true=N, n_pad=N_pad, compute_dtype=compute_dtype, exp_dtype=exp_dtype)

    out = pl.pallas_call(
        kernel,
        out_shape=jax.ShapeDtypeStruct((B, C, N_pad), f32),
        grid_spec=pltpu.PrefetchScalarGridSpec(
            num_scalar_prefetch=0,
            grid=(B, KV),
            in_specs=[
                pl.BlockSpec((1, C, N_pad), lambda b, kv: (b, 0, 0)),   # x
                pl.BlockSpec((R, C), lambda b, kv: (0, 0)),             # fused W
                pl.BlockSpec((R, 1), lambda b, kv: (0, 0)),             # fused b
            ],
            out_specs=pl.BlockSpec((1, C, N_pad), lambda b, kv: (b, 0, 0)),
            scratch_shapes=[
                pltpu.VMEM((R, N_pad), compute_dtype),   # fused q/k/v (+mask rows)
                pltpu.VMEM((1, N_pad), f32),             # running max
                pltpu.VMEM((1, N_pad), f32),             # running sum
            ],
        ),
        compiler_params=pltpu.CompilerParams(
            dimension_semantics=("parallel", "arbitrary"),
            vmem_limit_bytes=vmem_limit_bytes,
        ),
    )(x_flat, w_cd, b_full)

    if N_pad != N:
        out = out[:, :, :N]
    return out.reshape(B, C, W, H)


def channel_attention_ref(x_nchw, wq, bq, wk, bk, wv, bv, gamma):
    """Pure-JAX f32 reference mirroring the PyTorch forward."""
    B, C, W, H = x_nchw.shape
    N = W * H
    x = x_nchw.reshape(B, C, N).astype(jnp.float32)
    q = jnp.einsum('oc,bcn->bon', wq, x) + bq[None]
    k = jnp.einsum('oc,bcn->bon', wk, x) + bk[None]
    v = jnp.einsum('oc,bcn->bon', wv, x) + bv[None]
    s = jnp.einsum('bcn,bcm->bnm', q, k)
    a = jax.nn.softmax(s, axis=-1)
    out = jnp.einsum('bcn,bmn->bcm', v, a)
    return (gamma[0] * out + x).reshape(B, C, W, H)


if __name__ == "__main__":
    # Shapes consistent with the module: channelScalar=8 -> C divisible by 8.
    B, C, W, H = 2, 16, 16, 16
    scalar = 8
    Cr = C // scalar

    key = jax.random.PRNGKey(0)
    kx, kwq, kbq, kwk, kbk, kwv, kbv, kx2, kx3 = jax.random.split(key, 9)

    x = jax.random.normal(kx, (B, C, W, H), dtype=jnp.float32)
    # 1x1 conv weights: PyTorch (out, in, 1, 1) stored here as (out, in).
    wq = jax.random.normal(kwq, (Cr, C), dtype=jnp.float32) * 0.1
    bq = jax.random.normal(kbq, (Cr, 1), dtype=jnp.float32) * 0.1
    wk = jax.random.normal(kwk, (Cr, C), dtype=jnp.float32) * 0.1
    bk = jax.random.normal(kbk, (Cr, 1), dtype=jnp.float32) * 0.1
    wv = jax.random.normal(kwv, (C, C), dtype=jnp.float32) * 0.1
    bv = jax.random.normal(kbv, (C, 1), dtype=jnp.float32) * 0.1
    # gamma is nn.Parameter(zeros(1)) at init; use nonzero so attention matters.
    gamma = jnp.array([0.5], dtype=jnp.float32)

    ref = channel_attention_ref(x, wq, bq, wk, bk, wv, bv, gamma)

    # 1) bf16 MXU + bf16 exp path, multi-step online softmax (2 kv steps).
    out_bf16 = channel_attention(x, wq, bq, wk, bk, wv, bv, gamma,
                                 compute_dtype=jnp.bfloat16, kv_block=128)
    out_bf16 = jax.block_until_ready(out_bf16)
    assert out_bf16.shape == (B, C, W, H)
    assert jnp.allclose(out_bf16, ref, atol=2e-2, rtol=2e-2), "bf16 path mismatch"

    # 2) f32 path, per-generation default tiling (single kv step), tight tol.
    out_f32 = channel_attention(x, wq, bq, wk, bk, wv, bv, gamma,
                                compute_dtype=jnp.float32)
    out_f32 = jax.block_until_ready(out_f32)
    assert jnp.allclose(out_f32, ref, atol=5e-4, rtol=5e-4), "f32 path mismatch"

    # 3) Non-128-multiple spatial size (N=81) -> lane padding + folded key mask.
    x2 = jax.random.normal(kx2, (B, C, 9, 9), dtype=jnp.float32)
    ref2 = channel_attention_ref(x2, wq, bq, wk, bk, wv, bv, gamma)
    out2 = channel_attention(x2, wq, bq, wk, bk, wv, bv, gamma,
                             compute_dtype=jnp.float32, kv_block=128)
    out2 = jax.block_until_ready(out2)
    assert jnp.allclose(out2, ref2, atol=5e-4, rtol=5e-4), "padded/masked mismatch"

    # 4) bf16 + padding + multi-step (N=400 -> N_pad=512, 4 kv steps, last padded).
    x3 = jax.random.normal(kx3, (B, C, 20, 20), dtype=jnp.float32)
    ref3 = channel_attention_ref(x3, wq, bq, wk, bk, wv, bv, gamma)
    out3 = channel_attention(x3, wq, bq, wk, bk, wv, bv, gamma,
                             compute_dtype=jnp.bfloat16, kv_block=128)
    out3 = jax.block_until_ready(out3)
    assert jnp.allclose(out3, ref3, atol=2e-2, rtol=2e-2), "bf16 padded mismatch"

    print("KERNEL_OK")
</pallas_src>

<mosaic_0001>
module attributes {stable_mosaic.version = 11 : i64} {
  func.func @channel_attention_kernel(%arg0: i32, %arg1: i32, %arg2: memref<1x16x256xf32, #tpu.memory_space<vmem>>, %arg3: memref<64x16xbf16, #tpu.memory_space<vmem>>, %arg4: memref<64x1xf32, #tpu.memory_space<vmem>>, %arg5: memref<1x16x256xf32, #tpu.memory_space<vmem>>, %arg6: memref<64x256xbf16, #tpu.memory_space<vmem>>, %arg7: memref<1x256xf32, #tpu.memory_space<vmem>>, %arg8: memref<1x256xf32, #tpu.memory_space<vmem>>) attributes {dimension_semantics = [#tpu.dimension_semantics<parallel>, #tpu.dimension_semantics<arbitrary>], iteration_bounds = array<i64: 2, 2>, scalar_prefetch = 0 : i64, scratch_operands = 3 : i64, tpu.core_type = #tpu.core_type<tc>, window_params = [{transform_indices = @transform_0, window_bounds = array<i64: 1, 16, 256>}, {pipeline_mode = #tpu.pipeline_mode<synchronous>, transform_indices = @transform_1, window_bounds = array<i64: 64, 16>}, {pipeline_mode = #tpu.pipeline_mode<synchronous>, transform_indices = @transform_2, window_bounds = array<i64: 64, 1>}, {transform_indices = @transform_3, window_bounds = array<i64: 1, 16, 256>}]} {
    %c0_i32 = arith.constant 0 : i32
    %0 = arith.cmpi eq, %arg1, %c0_i32 : i32
    %1 = arith.extui %0 : i1 to i32
    %c0_i32_0 = arith.constant 0 : i32
    %2 = arith.cmpi ne, %1, %c0_i32_0 : i32
    scf.if %2 {
      %c0_19 = arith.constant 0 : index
      %c0_20 = arith.constant 0 : index
      %c0_21 = arith.constant 0 : index
      %40 = vector.load %arg2[%c0_19, %c0_20, %c0_21] : memref<1x16x256xf32, #tpu.memory_space<vmem>>, vector<1x16x256xf32>
      %41 = vector.shape_cast %40 : vector<1x16x256xf32> to vector<16x256xf32>
      %c0_22 = arith.constant 0 : index
      %c0_23 = arith.constant 0 : index
      %42 = vector.load %arg3[%c0_22, %c0_23] : memref<64x16xbf16, #tpu.memory_space<vmem>>, vector<64x16xbf16>
      %43 = arith.truncf %41 : vector<16x256xf32> to vector<16x256xbf16>
      %cst_24 = arith.constant dense<0.000000e+00> : vector<64x256xf32>
      %44 = tpu.matmul %42, %43, %cst_24 {dimension_numbers = #tpu.dot_dimension_numbers<[1], [0], [0], [1], [0, 0, 1, 1], [], []>} : vector<64x16xbf16>, vector<16x256xbf16>, vector<64x256xf32> -> vector<64x256xf32>
      %c0_25 = arith.constant 0 : index
      %c0_26 = arith.constant 0 : index
      %45 = vector.load %arg4[%c0_25, %c0_26] : memref<64x1xf32, #tpu.memory_space<vmem>>, vector<64x1xf32>
      %46 = vector.broadcast %45 : vector<64x1xf32> to vector<64x256xf32>
      %47 = arith.addf %44, %46 : vector<64x256xf32>
      %48 = arith.truncf %47 : vector<64x256xf32> to vector<64x256xbf16>
      %c0_27 = arith.constant 0 : index
      %c0_28 = arith.constant 0 : index
      %49 = vector.load %arg6[%c0_27, %c0_28] : memref<64x256xbf16, #tpu.memory_space<vmem>>, vector<64x256xbf16>
      tpu.vector_store %arg6[%c0_27, %c0_28], %48 {strides = array<i32>} : memref<64x256xbf16, #tpu.memory_space<vmem>>, vector<64x256xbf16>,
      %cst_29 = arith.constant 0xFF800000 : f32
      %50 = vector.broadcast %cst_29 : f32 to vector<1x256xf32>
      %c0_30 = arith.constant 0 : index
      %c0_31 = arith.constant 0 : index
      %51 = vector.load %arg7[%c0_30, %c0_31] : memref<1x256xf32, #tpu.memory_space<vmem>>, vector<1x256xf32>
      tpu.vector_store %arg7[%c0_30, %c0_31], %50 {strides = array<i32>} : memref<1x256xf32, #tpu.memory_space<vmem>>, vector<1x256xf32>,
      %cst_32 = arith.constant 0.000000e+00 : f32
      %52 = vector.broadcast %cst_32 : f32 to vector<1x256xf32>
      %c0_33 = arith.constant 0 : index
      %c0_34 = arith.constant 0 : index
      %53 = vector.load %arg8[%c0_33, %c0_34] : memref<1x256xf32, #tpu.memory_space<vmem>>, vector<1x256xf32>
      tpu.vector_store %arg8[%c0_33, %c0_34], %52 {strides = array<i32>} : memref<1x256xf32, #tpu.memory_space<vmem>>, vector<1x256xf32>,
      %cst_35 = arith.constant 0.000000e+00 : f32
      %54 = vector.broadcast %cst_35 : f32 to vector<16x256xf32>
      %c0_36 = arith.constant 0 : index
      %c0_37 = arith.constant 0 : index
      %c0_38 = arith.constant 0 : index
      %55 = vector.load %arg5[%c0_36, %c0_37, %c0_38] : memref<1x16x256xf32, #tpu.memory_space<vmem>>, vector<1x16x256xf32>
      %56 = vector.shape_cast %55 : vector<1x16x256xf32> to vector<16x256xf32>
      %57 = vector.shape_cast %54 : vector<16x256xf32> to vector<1x16x256xf32>
      tpu.vector_store %arg5[%c0_36, %c0_37, %c0_38], %57 {strides = array<i32>} : memref<1x16x256xf32, #tpu.memory_space<vmem>>, vector<1x16x256xf32>,
    } else {
    }
    %c128_i32 = arith.constant 128 : i32
    %3 = arith.muli %arg1, %c128_i32 : i32
    %4 = tpu.assume_multiple %3, 128 : i32
    %c0 = arith.constant 0 : index
    %c0_1 = arith.constant 0 : index
    %5 = vector.load %arg6[%c0, %c0_1] : memref<64x256xbf16, #tpu.memory_space<vmem>>, vector<16x256xbf16>
    %c16 = arith.constant 16 : index
    %6 = arith.index_cast %4 : i32 to index
    %7 = vector.load %arg6[%c16, %6] : memref<64x256xbf16, #tpu.memory_space<vmem>>, vector<16x128xbf16>
    %c32 = arith.constant 32 : index
    %8 = arith.index_cast %4 : i32 to index
    %9 = vector.load %arg6[%c32, %8] : memref<64x256xbf16, #tpu.memory_space<vmem>>, vector<32x128xbf16>
    %cst = arith.constant dense<0.000000e+00> : vector<128x256xf32>
    %10 = tpu.matmul %7, %5, %cst {dimension_numbers = #tpu.dot_dimension_numbers<[0], [0], [1], [1], [0, 1, 1, 1], [], []>} : vector<16x128xbf16>, vector<16x256xbf16>, vector<128x256xf32> -> vector<128x256xf32>
    %c0_2 = arith.constant 0 : index
    %c0_3 = arith.constant 0 : index
    %11 = vector.load %arg7[%c0_2, %c0_3] : memref<1x256xf32, #tpu.memory_space<vmem>>, vector<1x256xf32>
    %c0_4 = arith.constant 0 : index
    %c0_5 = arith.constant 0 : index
    %12 = vector.load %arg8[%c0_4, %c0_5] : memref<1x256xf32, #tpu.memory_space<vmem>>, vector<1x256xf32>
    %cst_6 = arith.constant dense<0xFF800000> : vector<256xf32>
    %13 = vector.multi_reduction <maximumf>, %10, %cst_6 [0] : vector<128x256xf32> to vector<256xf32>
    %14 = vector.shape_cast %13 : vector<256xf32> to vector<1x256xf32>
    %15 = arith.maximumf %11, %14 : vector<1x256xf32>
    %16 = arith.subf %11, %15 : vector<1x256xf32>
    %17 = math.exp %16 : vector<1x256xf32>
    %18 = vector.broadcast %15 : vector<1x256xf32> to vector<128x256xf32>
    %19 = arith.subf %10, %18 : vector<128x256xf32>
    %20 = arith.truncf %19 : vector<128x256xf32> to vector<128x256xbf16>
    %21 = math.exp %20 : vector<128x256xbf16>
    %cst_7 = arith.constant dense<0.000000e+00> : vector<32x256xf32>
    %22 = tpu.matmul %9, %21, %cst_7 {dimension_numbers = #tpu.dot_dimension_numbers<[1], [0], [0], [1], [0, 0, 1, 1], [], []>} : vector<32x128xbf16>, vector<128x256xbf16>, vector<32x256xf32> -> vector<32x256xf32>
    %23 = arith.mulf %17, %12 : vector<1x256xf32>
    %24 = vector.extract_strided_slice %22 {offsets = [16, 0], sizes = [1, 256], strides = [1, 1]} : vector<32x256xf32> to vector<1x256xf32>
    %25 = arith.addf %23, %24 : vector<1x256xf32>
    %c0_8 = arith.constant 0 : index
    %c0_9 = arith.constant 0 : index
    %26 = vector.load %arg8[%c0_8, %c0_9] : memref<1x256xf32, #tpu.memory_space<vmem>>, vector<1x256xf32>
    tpu.vector_store %arg8[%c0_8, %c0_9], %25 {strides = array<i32>} : memref<1x256xf32, #tpu.memory_space<vmem>>, vector<1x256xf32>,
    %c0_10 = arith.constant 0 : index
    %c0_11 = arith.constant 0 : index
    %27 = vector.load %arg7[%c0_10, %c0_11] : memref<1x256xf32, #tpu.memory_space<vmem>>, vector<1x256xf32>
    tpu.vector_store %arg7[%c0_10, %c0_11], %15 {strides = array<i32>} : memref<1x256xf32, #tpu.memory_space<vmem>>, vector<1x256xf32>,
    %c0_12 = arith.constant 0 : index
    %c0_13 = arith.constant 0 : index
    %c0_14 = arith.constant 0 : index
    %28 = vector.load %arg5[%c0_12, %c0_13, %c0_14] : memref<1x16x256xf32, #tpu.memory_space<vmem>>, vector<1x16x256xf32>
    %29 = vector.shape_cast %28 : vector<1x16x256xf32> to vector<16x256xf32>
    %30 = vector.broadcast %17 : vector<1x256xf32> to vector<16x256xf32>
    %31 = arith.mulf %30, %29 : vector<16x256xf32>
    %32 = vector.extract_strided_slice %22 {offsets = [0, 0], sizes = [16, 256], strides = [1, 1]} : vector<32x256xf32> to vector<16x256xf32>
    %33 = arith.addf %31, %32 : vector<16x256xf32>
    %c0_15 = arith.constant 0 : index
    %c0_16 = arith.constant 0 : index
    %c0_17 = arith.constant 0 : index
    %34 = vector.load %arg5[%c0_15, %c0_16, %c0_17] : memref<1x16x256xf32, #tpu.memory_space<vmem>>, vector<1x16x256xf32>
    %35 = vector.shape_cast %34 : vector<1x16x256xf32> to vector<16x256xf32>
    %36 = vector.shape_cast %33 : vector<16x256xf32> to vector<1x16x256xf32>
    tpu.vector_store %arg5[%c0_15, %c0_16, %c0_17], %36 {strides = array<i32>} : memref<1x16x256xf32, #tpu.memory_space<vmem>>, vector<1x16x256xf32>,
    %c1_i32 = arith.constant 1 : i32
    %37 = arith.cmpi eq, %arg1, %c1_i32 : i32
    %38 = arith.extui %37 : i1 to i32
    %c0_i32_18 = arith.constant 0 : i32
    %39 = arith.cmpi ne, %38, %c0_i32_18 : i32
    scf.if %39 {
      %c0_19 = arith.constant 0 : index
      %c0_20 = arith.constant 0 : index
      %40 = vector.load %arg8[%c0_19, %c0_20] : memref<1x256xf32, #tpu.memory_space<vmem>>, vector<1x256xf32>
      %41 = tpu.reciprocal %40 {approx = true} : vector<1x256xf32> -> vector<1x256xf32>
      %c0_21 = arith.constant 0 : index
      %c0_22 = arith.constant 0 : index
      %c0_23 = arith.constant 0 : index
      %42 = vector.load %arg5[%c0_21, %c0_22, %c0_23] : memref<1x16x256xf32, #tpu.memory_space<vmem>>, vector<1x16x256xf32>
      %43 = vector.shape_cast %42 : vector<1x16x256xf32> to vector<16x256xf32>
      %44 = vector.broadcast %41 : vector<1x256xf32> to vector<16x256xf32>
      %45 = arith.mulf %43, %44 : vector<16x256xf32>
      %c0_24 = arith.constant 0 : index
      %c0_25 = arith.constant 0 : index
      %c0_26 = arith.constant 0 : index
      %46 = vector.load %arg2[%c0_24, %c0_25, %c0_26] : memref<1x16x256xf32, #tpu.memory_space<vmem>>, vector<1x16x256xf32>
      %47 = vector.shape_cast %46 : vector<1x16x256xf32> to vector<16x256xf32>
      %48 = arith.addf %45, %47 : vector<16x256xf32>
      %c0_27 = arith.constant 0 : index
      %c0_28 = arith.constant 0 : index
      %c0_29 = arith.constant 0 : index
      %49 = vector.load %arg5[%c0_27, %c0_28, %c0_29] : memref<1x16x256xf32, #tpu.memory_space<vmem>>, vector<1x16x256xf32>
      %50 = vector.shape_cast %49 : vector<1x16x256xf32> to vector<16x256xf32>
      %51 = vector.shape_cast %48 : vector<16x256xf32> to vector<1x16x256xf32>
      tpu.vector_store %arg5[%c0_27, %c0_28, %c0_29], %51 {strides = array<i32>} : memref<1x16x256xf32, #tpu.memory_space<vmem>>, vector<1x16x256xf32>,
    } else {
    }
    return
  }
  func.func @transform_0(%arg0: i32, %arg1: i32) -> (i32, i32, i32) {
    %c0_i32 = arith.constant 0 : i32
    %c0_i32_0 = arith.constant 0 : i32
    %c0_i32_1 = arith.constant 0 : i32
    return %arg0, %c0_i32, %c0_i32_0 : i32, i32, i32
  }
  func.func @transform_1(%arg0: i32, %arg1: i32) -> (i32, i32) {
    %c0_i32 = arith.constant 0 : i32
    %c0_i32_0 = arith.constant 0 : i32
    %c0_i32_1 = arith.constant 0 : i32
    return %c0_i32, %c0_i32_0 : i32, i32
  }
  func.func @transform_2(%arg0: i32, %arg1: i32) -> (i32, i32) {
    %c0_i32 = arith.constant 0 : i32
    %c0_i32_0 = arith.constant 0 : i32
    %c0_i32_1 = arith.constant 0 : i32
    return %c0_i32, %c0_i32_0 : i32, i32
  }
  func.func @transform_3(%arg0: i32, %arg1: i32) -> (i32, i32, i32) {
    %c0_i32 = arith.constant 0 : i32
    %c0_i32_0 = arith.constant 0 : i32
    %c0_i32_1 = arith.constant 0 : i32
    return %arg0, %c0_i32, %c0_i32_0 : i32, i32, i32
  }
}

</mosaic_0001>

<bundles_post_ra>
// kernel: tpu_custom_call.1
= control target key start
LH: loop header
LB: loop body
LE: loop exit
PB: predicated region body
PF: predicated region fallthrough
CT: control target
= control target key end

     0   :  { %s1979_s0 = inlined_call_operand.hbm [shape: f32[2,16,256], index: 0, kind: input, shape index: {}]   ;;  %s1980_s1 = inlined_call_operand.hbm [shape: bf16[64,16], index: 1, kind: input, shape index: {}]   ;;  %s1981_s2 = inlined_call_operand.hbm [shape: f32[64,1], index: 2, kind: input, shape index: {}]   ;;  %s1982_s3 = inlined_call_operand.hbm [shape: f32[2,16,256], index: 3, kind: output, shape index: {}]  }
   0x1   :  { %1987 = sst [smem:[#allocation15_spill]] %s1980_s1 }
   0x2   :  { %8 = vsyncpa [#allocation6], 0 }
   0x3   :  { %10 = vsyncpa [#allocation6 + $0x1], 0 }
   0x4   :  { %11 = vsyncpa [#allocation9], 0 }
   0x5   :  { %12 = vsyncpa [#allocation7], 0 }
   0x6   :  { %14 = vsyncpa [#allocation7 + $0x1], 0  ;;  %s1450_s12 = smov 0   ;;  %s1452_s13 = smov 0  }
   0x7   :  { %s1454_s14 = smov 0   ;;  %s1456_s15 = smov 0  }
   0x8   :  { %s1458_s16 = smov 0   ;;  %s1460_s17 = smov 0  }
   0x9   :  { %s1462_s18 = smov 0   ;;  %s1464_s19 = smov 0  }
   0xa LB: > { %s1026_s20 = sadd.s32 4294967295, %s1411_s19   ;;  %s1027_s21 = sadd.s32 4294967294, %s1411_s19   ;;  %s1411_s19 = sphi %s1464_s19, %s20_s19   ;;  %s1407_s18 = sphi %s1462_s18, %s2011_s18   ;;  %s1403_s17 = sphi %s1460_s17, %s2010_s17   ;;  %s1399_s16 = sphi %s1458_s16, %s2009_s16   ;;  %s1395_s15 = sphi %s1456_s15, %s2008_s15   ;;  %s1391_s14 = sphi %s1454_s14, %s2007_s14   ;;  %s1387_s13 = sphi %s1452_s13, %s2006_s13   ;;  %s1383_s12 = sphi %s1450_s12, %s2005_s12  }
   0xb   : > { %p52_p0 = scmp.ne.s32.totalorder %s1387_s13, %s1383_s12  ;;  %p1494_p1 = scmp.eq.s32.totalorder %s1026_s20, 0 }
   0xc   : > { %p1498_p2 = scmp.eq.s32.totalorder %s1026_s20, 3  ;;  %p124_p3 = scmp.eq.s32.totalorder %s1027_s21, 3 }
   0xd   : > { %s1988_s22 = scalar_select %p1494_p1, 1, 0 }
   0xe   : > { %s1989_s23 = scalar_select %p1498_p2, 1, 0 }
   0xf   : > { %p1504_p4 = por %p1494_p1, %p52_p0  ;;  %p1028_p5 = scmp.ge.s32.totalorder %s1411_s19, 1 }
  0x10   : > { %p1509_p6 = por %p124_p3, %p52_p0  ;;  %p131_p7 = scmp.lt.s32.totalorder %s1411_s19, 5 }
  0x11   : > { %s1990_s24 = scalar_select %p1504_p4, 1, 0 }
  0x12   : > { %s1991_s25 = scalar_select %p1509_p6, 1, 0 }
  0x13   : > { %p1514_p8 = pnand %p1028_p5, %p131_p7  ;;  %s1413_s27 = smov [#allocation8]  }
  0x14   : > { %s143_s28 = sshll.u32 %s1413_s27, 4  ;;  %s1414_s30 = smov [#allocation10]   ;;  %s144_s28 = int_to_ptr.vmem [resolvable:$true] %s143_s28 }
  0x15   : > { %s1992_s26 = scalar_select %p1514_p8, 1, 0 }
  0x16   : > { %p1081_p9 = pneg %p1514_p8  ;;  %s156_s4 = sshll.u32 %s1414_s30, 4  ;;  %s1526_s4 = int_to_ptr.vmem [resolvable:$true] %s156_s4 }
  0x17   : > { %s1994_s1 = sld [smem:[#allocation15_spill]] }
  0x18   : > { %p1522_p10 = pnand %p1081_p9, %p1494_p1 }
  0x1a   : > { %p1225_p12 = pneg %p1522_p10 }
  0x1d   : > { %s1223_s7 = scalar_lea.hbm %s1994_s1, 512 }
  0x1e   : > { %p1224_p11 = scmp.ne.s32.totalorder %s1994_s1, %s1223_s7  ;;  %p1230_p3 = scmp.lt.u32.totalorder %s1223_s7, %s1994_s1 }
  0x20   : > { %p1226_p13 = pnand %p1225_p12, %p1224_p11 }
  0x22   : > { %p1227_p0 = pneg %p1226_p13 }
  0x24   : > { %p1232_p5 = pnand %p1230_p3, %p1227_p0 }
  0x26   : > { %1235 = shalt.err (!%p1232_p5)
}
  0x27   : > { %s1236_s20 = scalar_lea.vmem %s144_s28, 512  ;;  %p1244_p1 = scmp.lt.s32.totalorder %s144_s28, %s144_s28 }
  0x28   : > { %p1237_p7 = scmp.ne.s32.totalorder %s144_s28, %s1236_s20  ;;  %p1245_p4 = scmp.lt.s32.totalorder %s1236_s20, %s1236_s20 }
  0x2a   : > { %p1239_p9 = pnand %p1237_p7, %p1225_p12  ;;  %p1246_p8 = por %p1245_p4, %p1244_p1 }
  0x2c   : > { %p1240_p6 = pneg %p1239_p9 }
  0x2e   : > { %p1247_p2 = pnand %p1246_p8, %p1240_p6 }
  0x30   : > { %1250 = shalt.err (!%p1247_p2)
}
  0x31   : > { %s1415_s21 = smov 64   ;;  %s1416_s27 = smov 4  }
  0x32   : > { %1084 = dma.hbm_to_vmem [thread:$0]  (!%p1522_p10), %s1994_s1, 512, %s144_s28, [#allocation9], %s1415_s21, %s1415_s21, %s1416_s27  }
  0x33   : > { %s1251_s8 = scalar_lea.hbm %s1981_s2, 1024 }
  0x34   : > { %p1252_p11 = scmp.ne.s32.totalorder %s1981_s2, %s1251_s8  ;;  %p1258_p4 = scmp.lt.u32.totalorder %s1251_s8, %s1981_s2 }
  0x36   : > { %p1254_p1 = pnand %p1252_p11, %p1225_p12 }
  0x38   : > { %p1255_p2 = pneg %p1254_p1 }
  0x3a   : > { %p1260_p6 = pnand %p1258_p4, %p1255_p2 }
  0x3c   : > { %1263 = shalt.err (!%p1260_p6)
}
  0x3d   : > { %s1264_s28 = scalar_lea.vmem %s1526_s4, 1024  ;;  %p1272_p3 = scmp.lt.s32.totalorder %s1526_s4, %s1526_s4 }
  0x3e   : > { %p1265_p8 = scmp.ne.s32.totalorder %s1526_s4, %s1264_s28  ;;  %p1273_p5 = scmp.lt.s32.totalorder %s1264_s28, %s1264_s28 }
  0x40   : > { %p1267_p13 = pnand %p1265_p8, %p1225_p12  ;;  %p1274_p7 = por %p1273_p5, %p1272_p3 }
  0x42   : > { %p1268_p0 = pneg %p1267_p13 }
  0x44   : > { %p1275_p9 = pnand %p1274_p7, %p1268_p0 }
  0x46   : > { %1278 = shalt.err (!%p1275_p9)
}
  0x47   : > { %s1417_s21 = smov 128   ;;  %s1418_s27 = smov 8  }
  0x48   : > { %1087 = dma.hbm_to_vmem [thread:$0]  (!%p1522_p10), %s1981_s2, 1024, %s1526_s4, [#allocation9], %s1417_s21, %s1417_s21, %s1418_s27  }
  0x49   : > { %s29_s6 = sadd.s32 1, %s1403_s17  ;;  %s32_s7 = sadd.s32 1, %s1407_s18 }
  0x4a   : > { %p30_p12 = scmp.ge.s32.totalorder %s29_s6, 2  ;;  %s39_s8 = sadd.s32 1, %s1391_s14 }
  0x4b   : > { %p46_p11 = scmp.ne.s32.totalorder %s1391_s14, %s1387_s13  ;;  %p47_p1 = scmp.eq.s32.totalorder %s1411_s19, 0 }
  0x4c   : > { %s2013_s6 = smov (%p30_p12, %s29_s6), 0  ;;  %s2015_s7 = smov (!%p30_p12, %s32_s7), %s1407_s18 }
  0x4d   : > { %p1584_p2 = por %p47_p1, %p46_p11  ;;  %p1996_p4 = scmp.ne.s32.totalorder %s1989_s23, 0 }
  0x4e   : > { %p34_p10 = scmp.ge.s32.totalorder %s2015_s7, 2  ;;  %p1098_p8 = scmp.lt.s32.totalorder %s1411_s19, 4 }
  0x4f   : > { %p1590_p6 = por %p1996_p4, %p46_p11  ;;  %s170_s4 = sand.u32 1, %s1391_s14  }
  0x50   : > { %s1065_s10 = sshll.u32 %s1407_s18, 9  ;;  %s2017_s7 = smov (%p34_p10, %s2015_s7), 0 }
  0x51   : > { %s1032_s11 = sshll.u32 %s170_s4, 5  ;;  %s36_s20 = ssub.s32 %s1407_s18, %s2017_s7 }
  0x52   : > { %p37_p13 = scmp.eq.s32.totalorder %s36_s20, 0  ;;  %s1604_s27 = scalar_lea.hbm %s1979_s0, %s1065_s10 }
  0x53   : > { %s174_s23 = scalar_lea.vmem [#allocation5], %s1032_s11  ;;  %p1608_p0 = pnand %p1098_p8, %p1584_p2 }
  0x54   : > { %s181_s30 = sshll.u32 %s174_s23, 4  ;;  %s1617_s20 = scalar_lea.sflag [#allocation6], %s170_s4  ;;  %s1615_s30 = int_to_ptr.vmem [resolvable:$true] %s181_s30 }
  0x55   : > { %s1613_s1 = scalar_select %p37_p13, %s1391_s14, %s39_s8  }
  0x56   : > { %s1279_s10 = scalar_lea.hbm %s1604_s27, 512  ;;  %p1281_p5 = pneg %p1608_p0 }
  0x57   : > { %p1280_p3 = scmp.ne.s32.totalorder %s1604_s27, %s1279_s10  ;;  %s1284_s28 = scalar_lea.hbm %s1979_s0, 1024 }
  0x58   : > { %p1285_p12 = scmp.lt.u32.totalorder %s1604_s27, %s1979_s0  ;;  %p1286_p11 = scmp.lt.u32.totalorder %s1284_s28, %s1279_s10 }
  0x59   : > { %p1282_p7 = pnand %p1281_p5, %p1280_p3  ;;  %p1288_p2 = scmp.lt.u32.totalorder %s1279_s10, %s1604_s27 }
  0x5a   : > { %p1287_p1 = por %p1286_p11, %p1285_p12 }
  0x5b   : > { %p1283_p9 = pneg %p1282_p7 }
  0x5c   : > { %p1289_p4 = por %p1288_p2, %p1287_p1 }
  0x5e   : > { %p1290_p10 = pnand %p1289_p4, %p1283_p9 }
  0x60   : > { %1293 = shalt.err (!%p1290_p10)
}
  0x61   : > { %s1294_s8 = scalar_lea.vmem %s1615_s30, 512  ;;  %s1419_s4 = smov [#allocation5]  }
  0x62   : > { %p1295_p8 = scmp.ne.s32.totalorder %s1615_s30, %s1294_s8  ;;  %s1299_s9 = sshll.u32 %s1419_s4, 4  ;;  %s1300_s9 = int_to_ptr.vmem [resolvable:$false] %s1299_s9 }
  0x63   : > { %s1301_s11 = scalar_lea.vmem %s1300_s9, 1024  ;;  %p1302_p7 = scmp.lt.s32.totalorder %s1615_s30, %s1300_s9 }
  0x64   : > { %p1297_p13 = pnand %p1295_p8, %p1281_p5  ;;  %p1303_p12 = scmp.lt.s32.totalorder %s1301_s11, %s1294_s8 }
  0x66   : > { %p1298_p3 = pneg %p1297_p13  ;;  %p1304_p11 = por %p1303_p12, %p1302_p7 }
  0x68   : > { %p1305_p1 = pnand %p1304_p11, %p1298_p3 }
  0x6a   : > { %1308 = shalt.err (!%p1305_p1)
}
  0x6b   : > { %s1420_s10 = smov 256   ;;  %s1421_s28 = smov 16  }
  0x6c   : > { %1091 = dma.hbm_to_vmem [thread:$0]  (!%p1608_p0), %s1604_s27, 512, %s1615_s30, %s1617_s20, %s1420_s10, %s1420_s10, %s1421_s28  }
  0x6d   : > { %p1999_p5 = scmp.ne.s32.totalorder %s1992_s26, 0 }
  0x6e   : > { %s1648_s21 = sand.u32 (!%p1999_p5), 1, %s1387_s13   ;;  %p2000_p9 = scmp.ne.s32.totalorder (!%p1999_p5), %s1990_s24, 0 }
  0x6f   : > { %193 = sbr.rel (%p1999_p5) target bundleno = 1097 (0x449), region = 32  ;;  %s1036_s23 = sshll.u32 (!%p1999_p5), %s1648_s21, 5 }
  0x70   : > { %s196_s8 = scalar_lea.sflag (!%p1999_p5), [#allocation6], %s1648_s21  ;;  %s1652_s4 = scalar_lea.vmem (!%p1999_p5), [#allocation5], %s1036_s23 }
  0x76   : > { %1370 = dma.done.wait (%p2000_p9), %s196_s8, 512  }
  0x77   : > { %1372 = vsyncadd (%p2000_p9), %s196_s8, 4294966784  ;;  %p2001_p0 = scmp.ne.s32.totalorder %s1988_s22, 0 }
  0x79   : > { %1374 = dma.done.wait (%p2001_p0), [#allocation9], 1536  }
  0x7a   : > { %1376 = vsyncadd (%p2001_p0), [#allocation9], 4294965760  ;;  %s1662_s26 = scalar_lea.vmem [#allocation11], %s1036_s23  ;;  %p1040_p2 = scmp.ne.s32.totalorder %s1395_s15, 0 }
  0x7b   : > { %v236_v0 = vld [vmem:[%s1652_s4 + $0x8] sm:$0xff] (!%p1040_p2)  ;;  %v238_v1 = vld [vmem:[%s1652_s4 + $0x18] sm:$0xff] (!%p1040_p2)  ;;  %v235_v2 = vld [vmem:[%s1652_s4] sm:$0xff] (!%p1040_p2)  ;;  %v1422_v5 = vmov (!%p1040_p2), 0   ;;  %vm317_vm0 = vcmask (!%p1040_p2), 130048   ;;  %v419_v19 = vlaneseq (!%p1040_p2)  ;;  %v1423_v20 = vmov (!%p1040_p2), -inf  }
  0x7c   : > { %234 = sbr.rel (%p1040_p2) target bundleno = 358 (0x166), region = 48  ;;  %v248_v3 = vpack.c.bf16 (!%p1040_p2), %v238_v1, %v236_v0  ;;  %v237_v4 = vld [vmem:[%s1652_s4 + $0x10] sm:$0xff] (!%p1040_p2)  ;;  %362 = vmatprep.mubr.bf16.mxu0 (!%p1040_p2), %v1422_v5  ;;  %382 = vmatprep.mubr.bf16.mxu1 (!%p1040_p2), %v1422_v5  ;;  %v1183_v7 = vld [vmem:[#allocation8] sm:$0xff] (!%p1040_p2)   ;;  %v252_v11 = vld [vmem:[#allocation10 + $0x18] sm:$0xff] (!%p1040_p2)  ;;  %v1424_v21 = vmov (!%p1040_p2), 0.0  }
  0x7d   : > { %v247_v6 = vpack.c.bf16 (!%p1040_p2), %v237_v4, %v235_v2  ;;  %1182 = vset.pattern.permute.xlu1 (!%p1040_p2), %v1422_v5  ;;  %1181 = vset.pattern.permute.xlu0 (!%p1040_p2), %v1422_v5  ;;  %v1184_v8 = vld [vmem:[#allocation8 + $0x10] sm:$0xff] (!%p1040_p2)   ;;  %v249_v10 = vld [vmem:[#allocation10] sm:$0xff] (!%p1040_p2)  ;;  %v250_v12 = vld [vmem:[#allocation10 + $0x8] sm:$0xff] (!%p1040_p2)  ;;  %vm421_vm1 = vcmp.lt.s32.totalorder (!%p1040_p2), %v419_v19, 256  ;;  %425 = vst [vmem:[%s1662_s26] sm:$0xff] (!%p1040_p2), %v1424_v21 }
  0x7e   : > { %330 = vmatprep.subr.bf16.mxu0 (!%p1040_p2), %v248_v3  ;;  %1067 = vmatprep.subr.bf16.mxu1 (!%p1040_p2), %v248_v3  ;;  %v251_v9 = vld [vmem:[#allocation10 + $0x10] sm:$0xff] (!%p1040_p2)  ;;  %v1185_v13 = vld [vmem:[#allocation8 + $0x8] sm:$0xff] (!%p1040_p2)   ;;  %v1186_v14 = vld [vmem:[#allocation8 + $0x18] sm:$0xff] (!%p1040_p2)   ;;  %423 = vst.msk [vmem:[#allocation3] sm:$0x3] (!%p1040_p2), %vm421_vm1, %v1423_v20 }
  0x7f   : > { %331 = vmatpush1.bf16.msra.mxu0 (!%p1040_p2), %v247_v6  ;;  %1068 = vmatpush1.bf16.msra.mxu1 (!%p1040_p2), %v247_v6  ;;  %v254_v15 = vld [vmem:[#allocation10 + $0x28] sm:$0xff] (!%p1040_p2)  ;;  %v253_v16 = vld [vmem:[#allocation10 + $0x20] sm:$0xff] (!%p1040_p2)  ;;  %v256_v17 = vld [vmem:[#allocation10 + $0x38] sm:$0xff] (!%p1040_p2)  ;;  %424 = vst.msk [vmem:[#allocation4] sm:$0x3] (!%p1040_p2), %vm421_vm1, %v1424_v21 }
  0x80   : > { %269 = vperm.xlu1 (!%p1040_p2), %1182, %v251_v9   ;;  %259 = vperm.xlu0 (!%p1040_p2), %1181, %v249_v10   ;;  %v255_v18 = vld [vmem:[#allocation10 + $0x30] sm:$0xff] (!%p1040_p2)  ;;  %426 = vst [vmem:[%s1662_s26 + $0x8] sm:$0xff] (!%p1040_p2), %v1424_v21  ;;  %427 = vst [vmem:[%s1662_s26 + $0x10] sm:$0xff] (!%p1040_p2), %v1424_v21 }
  0x81   : > { %428 = vst [vmem:[%s1662_s26 + $0x18] sm:$0xff] (!%p1040_p2), %v1424_v21 }
  0x82   : > { %1045 = vmatmul.mubr.msk.bf16.vlgmr.msra.gmra.mrb[0].mxu0 (!%p1040_p2), %vm317_vm0, %v1183_v7  ;;  %1047 = vmatmul.mubr.msk.bf16.vlgmr.msra.gmra.mrb[0].mxu1 (!%p1040_p2), %vm317_vm0, %v1184_v8 }
  0x83   : > { %372 = vmatprep.mubr.bf16.mxu0 %v1422_v5  ;;  %392 = vmatprep.mubr.bf16.mxu1 %v1422_v5 }
  0x84   : > { %274 = vperm.xlu1 %1182, %v252_v11   ;;  %264 = vperm.xlu0 %1181, %v250_v12  }
  0x88   : > { %284 = vperm.xlu1 %1182, %v254_v15   ;;  %279 = vperm.xlu0 %1181, %v253_v16  }
  0x8a   : > { %1046 = vmatmul.mubr.msk.bf16.gmra.mrb[4].mxu0 %vm317_vm0, %v1185_v13  ;;  %1048 = vmatmul.mubr.msk.bf16.gmra.mrb[4].mxu1 %vm317_vm0, %v1186_v14 }
  0x8c   : > { %294 = vperm.xlu1 %1182, %v256_v17   ;;  %289 = vperm.xlu0 %1181, %v255_v18  }
  0xff   : > { %v270_v22 = vpop.permute.xlu1 %269  ;;  %v260_v23 = vpop.permute.xlu0 %259 }
 0x103   : > { %v275_v24 = vpop.permute.xlu1 %274  ;;  %v265_v25 = vpop.permute.xlu0 %264 }
 0x107   : > { %v285_v26 = vpop.permute.xlu1 %284  ;;  %v280_v27 = vpop.permute.xlu0 %279 }
 0x10b   : > { %v295_v48 = vpop.permute.xlu1 %294  ;;  %v290_v49 = vpop.permute.xlu0 %289 }
 0x155   : > { %v364_v28 = vpop.f32.mrb[0].mxu0  ;;  %v384_v29 = vpop.f32.mrb[0].mxu1 }
 0x156   : > { %v366_v30 = vpop.f32.mrb[1].mxu0  ;;  %v386_v31 = vpop.f32.mrb[1].mxu1  ;;  %v365_v34 = vadd.f32 %v364_v28, %v260_v23  ;;  %v385_v35 = vadd.f32 %v384_v29, %v280_v27 }
 0x157   : > { %v368_v32 = vpop.f32.mrb[2].mxu0  ;;  %v388_v33 = vpop.f32.mrb[2].mxu1  ;;  %v367_v40 = vadd.f32 %v366_v30, %v260_v23  ;;  %v387_v41 = vadd.f32 %v386_v31, %v280_v27 }
 0x158   : > { %v369_v36 = vadd.f32 %v368_v32, %v265_v25  ;;  %v389_v37 = vadd.f32 %v388_v33, %v285_v26  ;;  %v370_v38 = vpop.f32.mrb[3].mxu0  ;;  %v390_v39 = vpop.f32.mrb[3].mxu1 }
 0x159   : > { %v371_v42 = vadd.f32 %v370_v38, %v265_v25  ;;  %v391_v43 = vadd.f32 %v390_v39, %v285_v26 }
 0x15a   : > { %v403_v44 = vpack.c.bf16 %v369_v36, %v365_v34  ;;  %v407_v45 = vpack.c.bf16 %v389_v37, %v385_v35 }
 0x15b   : > { %v404_v46 = vpack.c.bf16 %v371_v42, %v367_v40  ;;  %v408_v47 = vpack.c.bf16 %v391_v43, %v387_v41 }
 0x15c   : > { %411 = vst [vmem:[#allocation2] sm:$0xff] %v403_v44  ;;  %415 = vst [vmem:[#allocation2 + $0x20] sm:$0xff] %v407_v45 }
 0x15d   : > { %412 = vst [vmem:[#allocation2 + $0x8] sm:$0xff] %v404_v46  ;;  %416 = vst [vmem:[#allocation2 + $0x28] sm:$0xff] %v408_v47  ;;  %v374_v50 = vpop.f32.mrb[4].mxu0  ;;  %v394_v51 = vpop.f32.mrb[4].mxu1 }
 0x15e   : > { %v376_v52 = vpop.f32.mrb[5].mxu0  ;;  %v396_v53 = vpop.f32.mrb[5].mxu1  ;;  %v375_v56 = vadd.f32 %v374_v50, %v270_v22  ;;  %v395_v57 = vadd.f32 %v394_v51, %v290_v49 }
 0x15f   : > { %v378_v54 = vpop.f32.mrb[6].mxu0  ;;  %v398_v55 = vpop.f32.mrb[6].mxu1  ;;  %v377_v62 = vadd.f32 %v376_v52, %v270_v22  ;;  %v397_v63 = vadd.f32 %v396_v53, %v290_v49 }
 0x160   : > { %v379_v58 = vadd.f32 %v378_v54, %v275_v24  ;;  %v399_v59 = vadd.f32 %v398_v55, %v295_v48  ;;  %v380_v60 = vpop.f32.mrb[7].mxu0  ;;  %v400_v61 = vpop.f32.mrb[7].mxu1 }
 0x161   : > { %v381_v0 = vadd.f32 %v380_v60, %v275_v24  ;;  %v401_v1 = vadd.f32 %v400_v61, %v295_v48 }
 0x162   : > { %v405_v2 = vpack.c.bf16 %v379_v58, %v375_v56  ;;  %v409_v3 = vpack.c.bf16 %v399_v59, %v395_v57 }
 0x163   : > { %v406_v4 = vpack.c.bf16 %v381_v0, %v377_v62  ;;  %v410_v5 = vpack.c.bf16 %v401_v1, %v397_v63 }
 0x164   : > { %413 = vst [vmem:[#allocation2 + $0x10] sm:$0xff] %v405_v2  ;;  %417 = vst [vmem:[#allocation2 + $0x30] sm:$0xff] %v409_v3 }
 0x165   : > { %414 = vst [vmem:[#allocation2 + $0x18] sm:$0xff] %v406_v4  ;;  %418 = vst [vmem:[#allocation2 + $0x38] sm:$0xff] %v410_v5 }
 0x166 PF: > { %s1049_s22 = sshll.u32 %s1395_s15, 7  ;;  %v431_v6 = vld [vmem:[#allocation2 + $0x8] sm:$0xff]  ;;  %v430_v7 = vld [vmem:[#allocation2] sm:$0xff]  ;;  %v1425_v8 = vmov 0   ;;  %vm455_vm2 = vcmask 130048   ;;  %p1059_p4 = scmp.ne.s32.totalorder %s1395_s15, 1 }
 0x167   : > { %s432_s24 = sshra.s32 %s1049_s22, 7  ;;  %480 = vmatprep.subr.bf16.mxu0 %v431_v6  ;;  %512 = vmatprep.mubr.bf16.mxu0 %v1425_v8 }
 0x168   : > { %s1050_s27 = sshll.u32 %s432_s24, 3  ;;  %481 = vmatpush1.bf16.msra.mxu0 %v430_v7  ;;  %798 = vmatprep.mubr.bf16.mxu1 %v1425_v8 }
 0x169   : > { %s1680_s30 = scalar_lea.vmem [#allocation2], %s1050_s27 }
 0x16c   : > { %v436_v9 = vld [vmem:[%s1680_s30 + $0x10] sm:$0xff] }
 0x16d   : > { %439 = vxpose.xlu0.c.b16.start.end [1/1] (short) %v436_v9, 128 }
 0x1d3   : > { %v447_v10 = vpop.trf.xlu0 }
 0x1d4   : > { %1051 = vmatmul.mubr.msk.bf16.vlgmr.msra.gmra.mrb[0].mxu0 %vm455_vm2, %v447_v10 }
 0x1d5   : > { %522 = vmatprep.mubr.bf16.mxu0 %v1425_v8 }
 0x1d7   : > { %v448_v11 = vpop.trf.xlu0 }
 0x1db   : > { %v449_v12 = vpop.trf.xlu0 }
 0x1dc   : > { %1052 = vmatmul.mubr.msk.bf16.gmra.mrb[4].mxu0 %vm455_vm2, %v448_v11 }
 0x1dd   : > { %532 = vmatprep.mubr.bf16.mxu0 %v1425_v8 }
 0x1df   : > { %v450_v13 = vpop.trf.xlu0 }
 0x1e3   : > { %v451_v14 = vpop.trf.xlu0 }
 0x1e4   : > { %1053 = vmatmul.mubr.msk.bf16.gmra.mrb[8].mxu0 %vm455_vm2, %v449_v12 }
 0x1e5   : > { %542 = vmatprep.mubr.bf16.mxu0 %v1425_v8 }
 0x1e7   : > { %v452_v15 = vpop.trf.xlu0 }
 0x1eb   : > { %v453_v16 = vpop.trf.xlu0 }
 0x1ec   : > { %1054 = vmatmul.mubr.msk.bf16.gmra.mrb[12].mxu0 %vm455_vm2, %v450_v13 }
 0x1ed   : > { %552 = vmatprep.mubr.bf16.mxu0 %v1425_v8 }
 0x1ef   : > { %v454_v17 = vpop.trf.xlu0 }
 0x1f4   : > { %1055 = vmatmul.mubr.msk.bf16.gmra.mrb[16].mxu0 %vm455_vm2, %v451_v14 }
 0x1f5   : > { %562 = vmatprep.mubr.bf16.mxu0 %v1425_v8 }
 0x1fc   : > { %1056 = vmatmul.mubr.msk.bf16.gmra.mrb[20].mxu0 %vm455_vm2, %v452_v15 }
 0x1fd   : > { %572 = vmatprep.mubr.bf16.mxu0 %v1425_v8 }
 0x204   : > { %1057 = vmatmul.mubr.msk.bf16.gmra.mrb[24].mxu0 %vm455_vm2, %v453_v16 }
 0x205   : > { %582 = vmatprep.mubr.bf16.mxu0 %v1425_v8 }
 0x20c   : > { %1058 = vmatmul.mubr.msk.bf16.gmra.mrb[28].mxu0 %vm455_vm2, %v454_v17 }
 0x2a7   : > { %v1698_v18 = vpop.f32.mrb[0].mxu0 }
 0x2a8   : > { %v1700_v19 = vpop.f32.mrb[1].mxu0 }
 0x2a9   : > { %v1702_v20 = vpop.f32.mrb[2].mxu0 }
 0x2aa   : > { %v1704_v21 = vpop.f32.mrb[3].mxu0 }
 0x2af   : > { %v1706_v22 = vpop.f32.mrb[4].mxu0 }
 0x2b0   : > { %v595_v23 = vmax.f32 %v1698_v18, %v1706_v22  ;;  %v1710_v24 = vpop.f32.mrb[5].mxu0 }
 0x2b1   : > { %v616_v25 = vmax.f32 %v1700_v19, %v1710_v24  ;;  %v1714_v26 = vpop.f32.mrb[6].mxu0 }
 0x2b2   : > { %v596_v27 = vmax.f32 %v1702_v20, %v1714_v26  ;;  %v1718_v28 = vpop.f32.mrb[7].mxu0 }
 0x2b3   : > { %v617_v29 = vmax.f32 %v1704_v21, %v1718_v28 }
 0x2b7   : > { %v1722_v30 = vpop.f32.mrb[8].mxu0 }
 0x2b8   : > { %v597_v31 = vmax.f32 %v595_v23, %v1722_v30  ;;  %v1725_v32 = vpop.f32.mrb[9].mxu0 }
 0x2b9   : > { %v618_v33 = vmax.f32 %v616_v25, %v1725_v32  ;;  %v1728_v34 = vpop.f32.mrb[10].mxu0 }
 0x2ba   : > { %v598_v35 = vmax.f32 %v596_v27, %v1728_v34  ;;  %v1731_v36 = vpop.f32.mrb[11].mxu0 }
 0x2bb   : > { %v619_v37 = vmax.f32 %v617_v29, %v1731_v36  ;;  %v1426_v29 = vmov 1966171168  }
 0x2bf   : > { %v1734_v38 = vpop.f32.mrb[12].mxu0 }
 0x2c0   : > { %v599_v39 = vmax.f32 %v597_v31, %v1734_v38  ;;  %v1737_v40 = vpop.f32.mrb[13].mxu0  ;;  %v641_v31 = vunpack.c.l.s4 %v1426_v29 }
 0x2c1   : > { %v620_v41 = vmax.f32 %v618_v33, %v1737_v40  ;;  %v1740_v42 = vpop.f32.mrb[14].mxu0  ;;  %v643_v33 = vlaneseq }
 0x2c2   : > { %v600_v43 = vmax.f32 %v598_v35, %v1740_v42  ;;  %v1743_v44 = vpop.f32.mrb[15].mxu0 }
 0x2c3   : > { %v621_v45 = vmax.f32 %v619_v37, %v1743_v44  ;;  %vm1796_vm3 = vcmp.lt.s32.totalorder %v643_v33, 256 }
 0x2c7   : > { %v1746_v46 = vpop.f32.mrb[16].mxu0 }
 0x2c8   : > { %v601_v47 = vmax.f32 %v599_v39, %v1746_v46  ;;  %v1749_v48 = vpop.f32.mrb[17].mxu0 }
 0x2c9   : > { %v622_v49 = vmax.f32 %v620_v41, %v1749_v48  ;;  %v1752_v50 = vpop.f32.mrb[18].mxu0 }
 0x2ca   : > { %v602_v51 = vmax.f32 %v600_v43, %v1752_v50  ;;  %v1755_v52 = vpop.f32.mrb[19].mxu0  ;;  %v642_v43 = vunpack.c.0.s8 %v641_v31 }
 0x2cb   : > { %v623_v53 = vmax.f32 %v621_v45, %v1755_v52  ;;  %v644_v45 = vshrl.u32 %v643_v33, 7 }
 0x2cf   : > { %v1758_v54 = vpop.f32.mrb[20].mxu0 }
 0x2d0   : > { %v603_v55 = vmax.f32 %v601_v47, %v1758_v54  ;;  %v1761_v56 = vpop.f32.mrb[21].mxu0 }
 0x2d1   : > { %v624_v57 = vmax.f32 %v622_v49, %v1761_v56  ;;  %v1764_v58 = vpop.f32.mrb[22].mxu0 }
 0x2d2   : > { %v604_v59 = vmax.f32 %v602_v51, %v1764_v58  ;;  %v1767_v60 = vpop.f32.mrb[23].mxu0 }
 0x2d3   : > { %v625_v61 = vmax.f32 %v623_v53, %v1767_v60 }
 0x2d7   : > { %v1770_v62 = vpop.f32.mrb[24].mxu0 }
 0x2d8   : > { %v605_v63 = vmax.f32 %v603_v55, %v1770_v62  ;;  %v1773_v0 = vpop.f32.mrb[25].mxu0  ;;  %v1788_v55 = vsub.s32 %v642_v43, %v644_v45 }
 0x2d9   : > { %v626_v1 = vmax.f32 %v624_v57, %v1773_v0  ;;  %v1776_v2 = vpop.f32.mrb[26].mxu0 }
 0x2da   : > { %v606_v3 = vmax.f32 %v604_v59, %v1776_v2  ;;  %v1779_v4 = vpop.f32.mrb[27].mxu0 }
 0x2db   : > { %v627_v5 = vmax.f32 %v625_v61, %v1779_v4  ;;  %v593_v61 = vld [vmem:[#allocation3] sm:$0x3] }
 0x2df   : > { %v1782_v6 = vpop.f32.mrb[28].mxu0 }
 0x2e0   : > { %v607_v7 = vmax.f32 %v605_v63, %v1782_v6  ;;  %v586_v9 = vpop.f32.mrb[29].mxu0 }
 0x2e1   : > { %v628_v10 = vmax.f32 %v626_v1, %v586_v9  ;;  %v1785_v11 = vpop.f32.mrb[30].mxu0  ;;  %v1792_v1 = vsub.s32 0, %v644_v45 }
 0x2e2   : > { %v608_v12 = vmax.f32 %v606_v3, %v1785_v11  ;;  %v590_v13 = vpop.f32.mrb[31].mxu0  ;;  %v1794_v3 = vsub.s32 1, %v644_v45 }
 0x2e3   : > { %v629_v14 = vmax.f32 %v627_v5, %v590_v13 }
 0x2e4   : > { %v609_v15 = vmax.f32 %v607_v7, %v608_v12 }
 0x2e5   : > { %v630_v16 = vmax.f32 %v628_v10, %v629_v14 }
 0x2e6   : > { %v610_v17 = vrot.slane %v609_v15, 4 }
 0x2e7   : > { %v631_v23 = vrot.slane %v630_v16, 4 }
 0x2e8   : > { %v611_v25 = vmax.f32 %v609_v15, %v610_v17 }
 0x2e9   : > { %v632_v27 = vmax.f32 %v630_v16, %v631_v23 }
 0x2ea   : > { %v612_v35 = vrot.slane %v611_v25, 2 }
 0x2eb   : > { %v633_v37 = vrot.slane %v632_v27, 2 }
 0x2ec   : > { %v613_v39 = vmax.f32 %v611_v25, %v612_v35 }
 0x2ed   : > { %v634_v41 = vmax.f32 %v632_v27, %v633_v37 }
 0x2ee   : > { %v614_v47 = vrot.slane %v613_v39, 1 }
 0x2ef   : > { %v635_v49 = vrot.slane %v634_v41, 1 }
 0x2f0   : > { %v615_v51 = vmax.f32 %v613_v39, %v614_v47 }
 0x2f1   : > { %v636_v53 = vmax.f32 %v634_v41, %v635_v49 }
 0x2f3   : > { %v639_v57 = vcombine.low %v615_v51, %v636_v53 }
 0x2f5   : > { %v646_v59 = vrot.slane %v639_v57, %v1788_v55 }
 0x2f7   : > { %v653_v63 = vrot.slane %v646_v59, %v1788_v55 }
 0x2f9   : > { %v655_v7 = vmax.f32 %v593_v61, %v653_v63 }
 0x2fb   : > { %v656_v10 = vsub.f32 %v593_v61, %v655_v7  ;;  %v1801_v12 = vrot.slane %v655_v7, %v1792_v1  ;;  %v1804_v14 = vrot.slane %v655_v7, %v1794_v3  ;;  %842 = vst.msk [vmem:[#allocation3] sm:$0x3] %vm1796_vm3, %v655_v7 }
 0x2fd   : > { %v657_v15 = vmul.f32 1.442695, %v656_v10  ;;  %v699_v16 = vsub.f32 %v586_v9, %v1804_v14  ;;  %v701_v17 = vsub.f32 %v590_v13, %v1804_v14  ;;  %v671_v23 = vsub.f32 %v1700_v19, %v1804_v14 }
 0x2fe   : > { %v673_v25 = vsub.f32 %v1704_v21, %v1804_v14  ;;  %v670_v27 = vsub.f32 %v1698_v18, %v1801_v12  ;;  %v672_v29 = vsub.f32 %v1702_v20, %v1801_v12  ;;  %v675_v31 = vsub.f32 %v1710_v24, %v1804_v14 }
 0x2ff   : > { %v1820_v33 = vpack.c.bf16 %v701_v17, %v699_v16  ;;  %v677_v9 = vsub.f32 %v1718_v28, %v1804_v14  ;;  %v674_v19 = vsub.f32 %v1706_v22, %v1801_v12  ;;  %v676_v21 = vsub.f32 %v1714_v26, %v1801_v12 }
 0x300   : > { %v703_v13 = vpack.c.bf16 %v673_v25, %v671_v23  ;;  %v702_v35 = vpack.c.bf16 %v672_v29, %v670_v27  ;;  %v679_v18 = vsub.f32 %v1725_v32, %v1804_v14  ;;  %1187 = vpow2.f32 %v657_v15 }
 0x301   : > { %v705_v20 = vpack.c.bf16 %v677_v9, %v675_v31  ;;  %v681_v24 = vsub.f32 %v1731_v36, %v1804_v14  ;;  %v678_v37 = vsub.f32 %v1722_v30, %v1801_v12  ;;  %v704_v41 = vpack.c.bf16 %v676_v21, %v674_v19 }
 0x302   : > { %v722_v28 = vmul.bf16 1069105081, %v703_v13  ;;  %v719_v39 = vmul.bf16 1069105081, %v702_v35  ;;  %v680_v22 = vsub.f32 %v1728_v34, %v1801_v12  ;;  %v683_v26 = vsub.f32 %v1737_v40, %v1804_v14 }
 0x303   : > { %v728_v43 = vmul.bf16 1069105081, %v705_v20  ;;  %v707_v45 = vpack.c.bf16 %v681_v24, %v679_v18  ;;  %v725_v32 = vmul.bf16 1069105081, %v704_v41  ;;  %v685_v36 = vsub.f32 %v1743_v44, %v1804_v14 }
 0x304   : > { %1189 = vpow.bf16 %v722_v28  ;;  %v706_v47 = vpack.c.bf16 %v680_v22, %v678_v37  ;;  %v682_v30 = vsub.f32 %v1734_v38, %v1801_v12  ;;  %v684_v51 = vsub.f32 %v1740_v42, %v1801_v12 }
 0x305   : > { %1191 = vpow.bf16 %v719_v39  ;;  %v734_v49 = vmul.bf16 1069105081, %v707_v45  ;;  %v709_v34 = vpack.c.bf16 %v685_v36, %v683_v26  ;;  %v687_v53 = vsub.f32 %v1749_v48, %v1804_v14  ;;  %v843_v36 = vld [vmem:[%s1662_s26] sm:$0xff] }
 0x306   : > { %1193 = vpow.bf16 %v728_v43  ;;  %v708_v40 = vpack.c.bf16 %v684_v51, %v682_v30  ;;  %v689_v57 = vsub.f32 %v1755_v52, %v1804_v14  ;;  %v686_v44 = vsub.f32 %v1746_v46, %v1801_v12  ;;  %v845_v30 = vld [vmem:[%s1662_s26 + $0x10] sm:$0xff] }
 0x307   : > { %1195 = vpow.bf16 %v725_v32  ;;  %v688_v59 = vsub.f32 %v1752_v50, %v1801_v12  ;;  %v691_v38 = vsub.f32 %v1761_v56, %v1804_v14  ;;  %v731_v42 = vmul.bf16 1069105081, %v706_v47  ;;  %v437_v32 = vld [vmem:[%s1680_s30 + $0x20] sm:$0xff]  ;;  %v438_v47 = vld [vmem:[%s1680_s30 + $0x30] sm:$0xff] }
 0x308   : > { %1197 = vpow.bf16 %v734_v49  ;;  %v711_v61 = vpack.c.bf16 %v689_v57, %v687_v53  ;;  %v693_v48 = vsub.f32 %v1767_v60, %v1804_v14  ;;  %v740_v63 = vmul.bf16 1069105081, %v709_v34  ;;  %v844_v49 = vld [vmem:[%s1662_s26 + $0x8] sm:$0xff]  ;;  %v846_v34 = vld [vmem:[%s1662_s26 + $0x18] sm:$0xff] }
 0x309   : > { %v710_v7 = vpack.c.bf16 %v688_v59, %v686_v44  ;;  %v690_v52 = vsub.f32 %v1758_v54, %v1801_v12  ;;  %v692_v46 = vsub.f32 %v1764_v58, %v1801_v12  ;;  %v695_v56 = vsub.f32 %v1773_v0, %v1804_v14 }
 0x30a   : > { %v1860_v10 = vpop.eup %1187  ;;  %v713_v50 = vpack.c.bf16 %v693_v48, %v691_v38  ;;  %v697_v16 = vsub.f32 %v1779_v4, %v1804_v14  ;;  %v694_v60 = vsub.f32 %v1770_v62, %v1801_v12  ;;  %1199 = vpow.bf16 %v731_v42 }
 0x30b   : > { %v712_v15 = vpack.c.bf16 %v692_v46, %v690_v52  ;;  %v737_v17 = vmul.bf16 1069105081, %v708_v40  ;;  %v696_v54 = vsub.f32 %v1776_v2, %v1801_v12  ;;  %v698_v58 = vsub.f32 %v1782_v6, %v1801_v12 }
 0x30c   : > { %1201 = vpow.bf16 %v740_v63  ;;  %v746_v23 = vmul.bf16 1069105081, %v711_v61  ;;  %v715_v25 = vpack.c.bf16 %v697_v16, %v695_v56  ;;  %v700_v0 = vsub.f32 %v1785_v11, %v1801_v12  ;;  %v594_v56 = vld [vmem:[#allocation4] sm:$0x3] }
 0x30d   : > { %v714_v29 = vpack.c.bf16 %v696_v54, %v694_v60  ;;  %v1876_v4 = vrot.slane %v1860_v10, %v1792_v1  ;;  %v1880_v62 = vrot.slane %v1860_v10, %v1794_v3  ;;  %1203 = vpow.bf16 %v737_v17 }
 0x30e   : > { %v716_v14 = vpack.c.bf16 %v700_v0, %v698_v58  ;;  %v743_v31 = vmul.bf16 1069105081, %v710_v7  ;;  %1205 = vpow.bf16 %v746_v23  ;;  %v752_v11 = vmul.bf16 1069105081, %v713_v50 }
 0x30f   : > { %v1190_v27 = vpop.eup %1189  ;;  %v749_v19 = vmul.bf16 1069105081, %v712_v15  ;;  %v758_v13 = vmul.bf16 1069105081, %v715_v25  ;;  %v755_v18 = vmul.bf16 1069105081, %v714_v29  ;;  %v858_v51 = vmul.f32 %v1876_v4, %v843_v36 }
 0x310   : > { %v1192_v2 = vpop.eup %1191  ;;  %766 = vmatprep.subr.bf16.mxu1 %v1190_v27  ;;  %1207 = vpow.bf16 %v743_v31  ;;  %v764_v20 = vmul.bf16 1069105081, %v1820_v33  ;;  %v761_v28 = vmul.bf16 1069105081, %v716_v14  ;;  %v859_v40 = vmul.f32 %v1880_v62, %v844_v49  ;;  %v895_v27 = vld [vmem:[%s1652_s4] sm:$0xff] (!%p1059_p4) }
 0x311   : > { %v1194_v6 = vpop.eup %1193  ;;  %767 = vmatpush1.bf16.msra.mxu1 %v1192_v2  ;;  %1209 = vpow.bf16 %v752_v11  ;;  %v860_v59 = vmul.f32 %v1876_v4, %v845_v30  ;;  %v861_v42 = vmul.f32 %v1880_v62, %v846_v34  ;;  %v817_v60 = vmul.f32 %v1860_v10, %v594_v56  ;;  %v896_v4 = vld [vmem:[%s1652_s4 + $0x8] sm:$0xff] (!%p1059_p4)  ;;  %v897_v62 = vld [vmem:[%s1652_s4 + $0x10] sm:$0xff] (!%p1059_p4)  ;;  %v898_v2 = vld [vmem:[%s1652_s4 + $0x18] sm:$0xff] (!%p1059_p4) }
 0x312   : > { %768 = vmatprep.subr.bf16.mxu1 %v1194_v6  ;;  %v1196_v12 = vpop.eup %1195  ;;  %1211 = vpow.bf16 %v749_v19 }
 0x313   : > { %v1198_v9 = vpop.eup %1197  ;;  %1213 = vpow.bf16 %v758_v13 }
 0x314   : > { %1215 = vpow.bf16 %v755_v18 }
 0x315   : > { %769 = vmatpush1.bf16.msra.mxu1 %v1196_v12  ;;  %v1200_v35 = vpop.eup %1199  ;;  %1217 = vpow.bf16 %v764_v20 }
 0x316   : > { %770 = vmatprep.subr.bf16.mxu1 %v1198_v9  ;;  %1219 = vpow.bf16 %v761_v28 }
 0x317   : > { %v1202_v21 = vpop.eup %1201 }
 0x318   : > { %v1204_v24 = vpop.eup %1203 }
 0x319   : > { %771 = vmatpush1.bf16.msra.mxu1 %v1200_v35  ;;  %v1206_v37 = vpop.eup %1205 }
 0x31a   : > { %772 = vmatprep.subr.bf16.mxu1 %v1202_v21 }
 0x31b   : > { %v1208_v39 = vpop.eup %1207 }
 0x31c   : > { %v1210_v41 = vpop.eup %1209 }
 0x31d   : > { %773 = vmatpush1.bf16.msra.mxu1 %v1204_v24  ;;  %v1212_v22 = vpop.eup %1211 }
 0x31e   : > { %774 = vmatprep.subr.bf16.mxu1 %v1206_v37  ;;  %v1214_v33 = vpop.eup %1213 }
 0x31f   : > { %v1216_v43 = vpop.eup %1215 }
 0x320   : > { %v1218_v45 = vpop.eup %1217 }
 0x321   : > { %775 = vmatpush1.bf16.msra.mxu1 %v1208_v39  ;;  %v1220_v26 = vpop.eup %1219 }
 0x322   : > { %776 = vmatprep.subr.bf16.mxu1 %v1210_v41 }
 0x325   : > { %777 = vmatpush1.bf16.msra.mxu1 %v1212_v22 }
 0x326   : > { %778 = vmatprep.subr.bf16.mxu1 %v1214_v33 }
 0x329   : > { %779 = vmatpush1.bf16.msra.mxu1 %v1216_v43 }
 0x32a   : > { %780 = vmatprep.subr.bf16.mxu1 %v1218_v45 }
 0x32d   : > { %781 = vmatpush1.bf16.msra.mxu1 %v1220_v26 }
 0x330   : > { %799 = vmatmul.mubr.bf16.vlgmr.msra.gmra.mrb[0].mxu1 %v437_v32 }
 0x331   : > { %808 = vmatprep.mubr.bf16.mxu1 %v1425_v8 }
 0x338   : > { %809 = vmatmul.mubr.bf16.gmra.mrb[4].mxu1 %v438_v47 }
 0x403   : > { %v800_v53 = vpop.f32.mrb[0].mxu1 }
 0x404   : > { %v862_v57 = vadd.f32 %v858_v51, %v800_v53  ;;  %v802_v44 = vpop.f32.mrb[1].mxu1 }
 0x405   : > { %v863_v8 = vadd.f32 %v859_v40, %v802_v44  ;;  %v804_v38 = vpop.f32.mrb[2].mxu1 }
 0x406   : > { %866 = vst [vmem:[%s1662_s26] sm:$0xff] %v862_v57  ;;  %v864_v61 = vadd.f32 %v860_v59, %v804_v38  ;;  %v806_v48 = vpop.f32.mrb[3].mxu1 }
 0x407   : > { %867 = vst [vmem:[%s1662_s26 + $0x8] sm:$0xff] %v863_v8  ;;  %v865_v63 = vadd.f32 %v861_v42, %v806_v48 }
 0x408   : > { %868 = vst [vmem:[%s1662_s26 + $0x10] sm:$0xff] %v864_v61 }
 0x409   : > { %869 = vst [vmem:[%s1662_s26 + $0x18] sm:$0xff] %v865_v63 }
 0x40b   : > { %v810_v7 = vpop.f32.mrb[4].mxu1 }
 0x40c   : > { %v812_v52 = vpop.f32.mrb[5].mxu1 }
 0x40d   : > { %v820_v46 = vcombine.low %v810_v7, %v812_v52  ;;  %v814_v50 = vpop.f32.mrb[6].mxu1  ;;  %v876_v10 = vld [vmem:[%s1662_s26] sm:$0xff] (!%p1059_p4) }
 0x40e   : > { %v815_v15 = vpop.f32.mrb[7].mxu1 }
 0x40f   : > { %v827_v16 = vrot.slane %v820_v46, %v1788_v55  ;;  %873 = sbr.rel (%p1059_p4) target bundleno = 1072 (0x430), region = 52  ;;  %v878_v25 = vld [vmem:[%s1662_s26 + $0x10] sm:$0xff] (!%p1059_p4) }
 0x410   : > { %v879_v5 = vld [vmem:[%s1662_s26 + $0x18] sm:$0xff] (!%p1059_p4) }
 0x411   : > { %v834_v17 = vrot.slane %v827_v16, %v1788_v55  ;;  %v877_v55 = vld [vmem:[%s1662_s26 + $0x8] sm:$0xff] (!%p1059_p4) }
 0x413   : > { %v836_v54 = vadd.f32 %v834_v17, %v817_v60 }
 0x415   : > { %841 = vst.msk [vmem:[#allocation4] sm:$0x3] %vm1796_vm3, %v836_v54 }
 0x41c   : > { %v874_v58 = vld [vmem:[#allocation4] sm:$0x3] }
 0x41d   : > { %1221 = vrcp.f32 %v874_v58 }
 0x427   : > { %v1222_v23 = vpop.eup %1221 }
 0x428   : > { %v884_v0 = vrot.slane %v1222_v23, %v1792_v1  ;;  %v888_v29 = vrot.slane %v1222_v23, %v1794_v3 }
 0x42a   : > { %v891_v14 = vmul.f32 %v884_v0, %v876_v10  ;;  %v892_v6 = vmul.f32 %v888_v29, %v877_v55  ;;  %v893_v31 = vmul.f32 %v884_v0, %v878_v25  ;;  %v894_v11 = vmul.f32 %v888_v29, %v879_v5 }
 0x42c   : > { %v899_v12 = vadd.f32 %v895_v27, %v891_v14  ;;  %v900_v9 = vadd.f32 %v896_v4, %v892_v6  ;;  %v901_v19 = vadd.f32 %v897_v62, %v893_v31  ;;  %v902_v13 = vadd.f32 %v898_v2, %v894_v11 }
 0x42e   : > { %903 = vst [vmem:[%s1662_s26] sm:$0xff] %v899_v12  ;;  %904 = vst [vmem:[%s1662_s26 + $0x8] sm:$0xff] %v900_v9 }
 0x42f   : > { %905 = vst [vmem:[%s1662_s26 + $0x10] sm:$0xff] %v901_v19  ;;  %906 = vst [vmem:[%s1662_s26 + $0x18] sm:$0xff] %v902_v13 }
 0x430 PF: > { %s1066_s15 = sshll.u32 %s1399_s16, 9  ;;  %s921_s11 = sshll.u32 %s1662_s26, 4  ;;  %s1925_s11 = int_to_ptr.vmem [resolvable:$true] %s921_s11 }
 0x431   : > { %s1922_s9 = scalar_lea.hbm %s1982_s3, %s1066_s15  ;;  %s908_s10 = scalar_lea.sflag [#allocation7], %s1648_s21 }
 0x432   : > { %s1309_s28 = scalar_lea.vmem %s1925_s11, 512  ;;  %s1427_s23 = smov [#allocation11]  }
 0x433   : > { %p1310_p10 = scmp.ne.s32.totalorder %s1925_s11, %s1309_s28  ;;  %s1313_s8 = sshll.u32 %s1427_s23, 4  ;;  %s1314_s8 = int_to_ptr.vmem [resolvable:$false] %s1313_s8 }
 0x434   : > { %s1315_s16 = scalar_lea.vmem %s1314_s8, 1024  ;;  %p1316_p3 = scmp.lt.s32.totalorder %s1925_s11, %s1314_s8 }
 0x435   : > { %p1311_p8 = pnand %p1310_p10, %p1590_p6  ;;  %p1317_p7 = scmp.lt.s32.totalorder %s1315_s16, %s1309_s28 }
 0x437   : > { %p1312_p13 = pneg %p1311_p8  ;;  %p1318_p12 = por %p1317_p7, %p1316_p3 }
 0x439   : > { %p1319_p11 = pnand %p1318_p12, %p1312_p13 }
 0x43b   : > { %1322 = shalt.err (!%p1319_p11)
}
 0x43c   : > { %s1323_s4 = scalar_lea.hbm %s1922_s9, 512  ;;  %s1327_s24 = scalar_lea.hbm %s1982_s3, 1024 }
 0x43d   : > { %p1324_p1 = scmp.ne.s32.totalorder %s1922_s9, %s1323_s4  ;;  %p1328_p0 = scmp.lt.u32.totalorder %s1922_s9, %s1982_s3 }
 0x43e   : > { %p1329_p2 = scmp.lt.u32.totalorder %s1327_s24, %s1323_s4  ;;  %p1331_p10 = scmp.lt.u32.totalorder %s1323_s4, %s1922_s9 }
 0x43f   : > { %p1325_p5 = pnand %p1324_p1, %p1590_p6 }
 0x440   : > { %p1330_p4 = por %p1329_p2, %p1328_p0 }
 0x441   : > { %p1326_p9 = pneg %p1325_p5 }
 0x442   : > { %p1332_p8 = por %p1331_p10, %p1330_p4 }
 0x444   : > { %p1333_p13 = pnand %p1332_p8, %p1326_p9 }
 0x446   : > { %1336 = shalt.err (!%p1333_p13)
}
 0x447   : > { %s1428_s15 = smov 256   ;;  %s1429_s5 = smov 16  }
 0x448   : > { %1079 = dma.vmem_to_hbm [thread:$0]  (%p1590_p6), %s1925_s11, 512, %s1922_s9, %s908_s10, %s1428_s15, %s1428_s15, %s1429_s5  }
 0x449 PF: > { %p1101_p3 = scmp.ge.s32.totalorder %s1411_s19, 2  ;;  %s936_s20 = sand.u32 1, %s1383_s12  }
 0x44a   : > { %p2004_p7 = scmp.ne.s32.totalorder %s1991_s25, 0  ;;  %s937_s28 = scalar_lea.sflag [#allocation7], %s936_s20 }
 0x44c   : > { %p1093_p12 = pnand %p1101_p3, %p2004_p7 }
 0x44e   : > { %1378 = dma.done.wait (!%p1093_p12), %s937_s28, 512  }
 0x44f   : > { %1380 = vsyncadd (!%p1093_p12), %s937_s28, 4294966784  ;;  %s20_s19 = sadd.s32 1, %s1411_s19   ;;  %s2005_s12 = smov %s1387_s13 }
 0x450   : > { %p17_p11 = scmp.ge.s32.totalorder %s20_s19, 6   ;;  %s2006_s13 = smov %s1391_s14 }
 0x451   : > { %s2007_s14 = smov %s1613_s1  ;;  %s2008_s15 = smov %s1403_s17 }
 0x452   : > { %s2009_s16 = smov %s1407_s18  ;;  %s2010_s17 = smov %s2013_s6 }
 0x453   : > { %s2011_s18 = smov %s2017_s7  ;;  %19 = sbr.rel (!%p17_p11) target bundleno = 10 (0xa), region = 94 }
 0x45a   :  { %942 = vsyncpa [#allocation6], 1 }
 0x45b   :  { %944 = vsyncpa [#allocation6 + $0x1], 1 }
 0x45c   :  { %945 = vsyncpa [#allocation9], 1 }
 0x45d   :  { %946 = vsyncpa [#allocation7], 1 }
 0x45e   :  { %948 = vsyncpa [#allocation7 + $0x1], 1 }

</bundles_post_ra>
